<compile_context>
chip_gen: v6e
topology: v6e:2x2x1
jax: 0.10.0
libtpu: 0.0.40
codegen_flags: <defaults>
</compile_context>

<pallas_src>
import functools

import numpy as np
import jax
import jax.numpy as jnp
from jax.experimental import pallas as pl
from jax.experimental.pallas import tpu as pltpu


# ----------------------------------------------------------------------------
# Fused kernel: all ConvTranspose1d(k=2, s=2) layers + ReLUs in one invocation
# ----------------------------------------------------------------------------
def _convnet_kernel(x_ref, *refs, n_layers):
    # refs = (wbd_0, bbd_0, wbd_1, bbd_1, ..., out_ref)
    #   wbd_l : (2^l*C_l, 2^{l+1}*C_{l+1})  block-diag of [W_l[:,:,0] | W_l[:,:,1]]
    #   bbd_l : (1,       2^{l+1}*C_{l+1})  tiled bias
    # Activations stay (rows, lanes) with lanes = (tap bits msb-first, channel),
    # so each layer is exactly one MXU matmul + bias (+ ReLU on hidden layers)
    # and the final layer is one lane-dense full-block store.
    out_ref = refs[-1]
    h = x_ref[...]                                   # (rows, C_in) f32
    for l in range(n_layers):
        w = refs[2 * l][...]
        b = refs[2 * l + 1][...]
        z = jnp.dot(h, w, preferred_element_type=jnp.float32) + b
        if l < n_layers - 1:
            h = jnp.maximum(z, 0.0)                  # nn.ReLU() on hidden layers
        else:
            out_ref[...] = z                         # nn.Identity(): single store


def convnet_forward(x, params, *, batch_tile=None,
                    vmem_budget_bytes=24 * 1024 * 1024):
    """x: (B, C_in, L0), params: list of (w (C_l, C_{l+1}, 2), b (C_{l+1},)).

    Returns (B, C_out, L0 * 2**n_layers), matching PyTorch ConvNet.forward.
    """
    B, c_in, L0 = x.shape
    n_layers = len(params)
    S = 1 << n_layers                     # spatial upsampling factor
    c_out = params[-1][0].shape[1]
    Lf = L0 * S

    # Lane width of the activation entering / leaving each layer.
    chans = [c_in] + [w.shape[1] for (w, _) in params]
    widths = [c_in] + [(1 << (l + 1)) * chans[l + 1] for l in range(n_layers)]

    # ---- pack block-diagonal weights / tiled biases (host-side glue, tiny) --
    flat_w = []
    fixed_bytes = 0
    for l, (w, b) in enumerate(params):
        r = 1 << l
        wcat = jnp.concatenate([w[:, :, 0], w[:, :, 1]], axis=1)   # (C_l, 2*C_{l+1})
        wbd = jnp.kron(jnp.eye(r, dtype=jnp.float32), wcat)        # (r*C_l, 2r*C_{l+1})
        bbd = jnp.tile(jnp.concatenate([b, b]), r)[None, :]        # (1,     2r*C_{l+1})
        flat_w += [wbd, bbd]
        fixed_bytes += 2 * 4 * (wbd.shape[0] * wbd.shape[1] + bbd.shape[1])

    # ---- pick batch tile: fit VMEM budget, create >=2 pipelined grid steps ---
    peak_act = max(widths[l] + widths[l + 1] for l in range(n_layers))
    # in/out blocks double-buffered + peak live layer temporaries, per row.
    per_row = 4 * (2 * widths[0] + 2 * widths[-1] + peak_act)
    divisors = [d for d in range(1, B + 1)
                if B % d == 0 and ((d * L0) % 8 == 0 or d == B)]
    if batch_tile is not None:
        ok = [d for d in divisors if d <= batch_tile]
        bt = max(ok) if ok else min(divisors)
    else:
        ok = [d for d in divisors
              if fixed_bytes + d * L0 * per_row <= vmem_budget_bytes] or [min(divisors)]
        bt = max(ok)
        # >= 2 grid steps: feeds both v7x TensorCores and overlaps DMA/compute.
        if bt == B and B > 1 and any(d < B for d in ok):
            bt = max(d for d in ok if d < B)
        # Prefer >= 4 pipelined steps while tiles keep >= ~512 rows
        # (per-step overhead ~0.35 us; smaller tiles fall below HBM roofline).
        while B // bt < 4:
            smaller = [d for d in ok if d < bt and d * L0 >= 512]
            if not smaller:
                break
            bt = max(smaller)
    n_tiles = B // bt
    m0 = bt * L0                          # rows per grid step

    # Glue: NCL -> row-major (B*L0, C_in); channels on the lane axis.
    x2d = jnp.transpose(x, (0, 2, 1)).reshape(B * L0, c_in).astype(jnp.float32)

    in_specs = [pl.BlockSpec((m0, c_in), lambda i: (i, 0))]
    for arr in flat_w:                    # grid-invariant weights: block = full array
        in_specs.append(pl.BlockSpec(arr.shape, lambda i: (0, 0)))

    out_w = S * c_out                     # lane-dense output: (rows, S*c_out)
    out2d = pl.pallas_call(
        functools.partial(_convnet_kernel, n_layers=n_layers),
        out_shape=jax.ShapeDtypeStruct((B * L0, out_w), jnp.float32),
        grid=(n_tiles,),
        in_specs=in_specs,
        out_specs=pl.BlockSpec((m0, out_w), lambda i: (i, 0)),
        compiler_params=pltpu.CompilerParams(
            dimension_semantics=("parallel",),
            vmem_limit_bytes=32 * 1024 * 1024),
    )(x2d, *flat_w)

    # Lane axis is already (spatial offset within S, channel) in natural order
    # (tap bits accumulate msb-first), so no permutation is needed — just glue.
    out = out2d.reshape(B, Lf, c_out)     # final position p = i*S + offset
    return jnp.transpose(out, (0, 2, 1))  # (B, C_out, Lf)


# ----------------------------------------------------------------------------
# Parameters & plain-JAX reference
# ----------------------------------------------------------------------------
def init_params(key, inchannels, hchannels, outchannels, kernel=2):
    channels = [inchannels] + list(hchannels) + [outchannels]
    params = []
    for l in range(len(channels) - 1):
        key, kw, kb = jax.random.split(key, 3)
        cin, cout = channels[l], channels[l + 1]
        scale = 1.0 / np.sqrt(cin * kernel)
        w = scale * jax.random.normal(kw, (cin, cout, kernel), jnp.float32)
        b = scale * jax.random.normal(kb, (cout,), jnp.float32)
        params.append((w, b))
    return params


def convnet_reference(x, params):
    """Direct ConvTranspose1d(k=2, s=2) + ReLU stack, plain JAX."""
    h = x.astype(jnp.float32)
    n = len(params)
    for l, (w, b) in enumerate(params):
        y0 = jnp.einsum("bcl,co->bol", h, w[:, :, 0],
                        precision=jax.lax.Precision.HIGHEST) + b[None, :, None]
        y1 = jnp.einsum("bcl,co->bol", h, w[:, :, 1],
                        precision=jax.lax.Precision.HIGHEST) + b[None, :, None]
        bsz, cout, L = y0.shape
        y = jnp.zeros((bsz, cout, 2 * L), jnp.float32)
        y = y.at[:, :, 0::2].set(y0).at[:, :, 1::2].set(y1)
        if l < n - 1:                      # ReLU on hidden layers only
            y = jnp.maximum(y, 0.0)
        h = y
    return h


if __name__ == "__main__":
    key = jax.random.PRNGKey(0)
    kx, kp = jax.random.split(key)

    # Small shapes consistent with the module: ConvNet(4, 8, [32, 64], kernel=2)
    B, C_IN, L0 = 2, 4, 8
    H_CH, C_OUT = [32, 64], 8

    x = jax.random.normal(kx, (B, C_IN, L0), jnp.float32)
    params = init_params(kp, C_IN, H_CH, C_OUT)

    fwd = jax.jit(convnet_forward)
    y = jax.block_until_ready(fwd(x, params))

    y_ref = convnet_reference(x, params)
    n_layers = len(params)
    assert y.shape == (B, C_OUT, L0 * 2 ** n_layers), y.shape
    assert bool(jnp.all(jnp.isfinite(y)))
    assert jnp.allclose(y, y_ref, rtol=1e-3, atol=1e-4), float(
        jnp.max(jnp.abs(y - y_ref))
    )
    print("KERNEL_OK")
</pallas_src>

<mosaic_0001>
module attributes {stable_mosaic.version = 11 : i64} {
  func.func @_convnet_kernel(%arg0: i32, %arg1: memref<8x4xf32, #tpu.memory_space<vmem>>, %arg2: memref<4x64xf32, #tpu.memory_space<vmem>>, %arg3: memref<1x64xf32, #tpu.memory_space<vmem>>, %arg4: memref<64x256xf32, #tpu.memory_space<vmem>>, %arg5: memref<1x256xf32, #tpu.memory_space<vmem>>, %arg6: memref<256x64xf32, #tpu.memory_space<vmem>>, %arg7: memref<1x64xf32, #tpu.memory_space<vmem>>, %arg8: memref<8x64xf32, #tpu.memory_space<vmem>>) attributes {dimension_semantics = [#tpu.dimension_semantics<parallel>], iteration_bounds = array<i64: 2>, scalar_prefetch = 0 : i64, scratch_operands = 0 : i64, tpu.core_type = #tpu.core_type<tc>, window_params = [{transform_indices = @transform_0, window_bounds = array<i64: 8, 4>}, {pipeline_mode = #tpu.pipeline_mode<synchronous>, transform_indices = @transform_1, window_bounds = array<i64: 4, 64>}, {pipeline_mode = #tpu.pipeline_mode<synchronous>, transform_indices = @transform_2, window_bounds = array<i64: 1, 64>}, {pipeline_mode = #tpu.pipeline_mode<synchronous>, transform_indices = @transform_3, window_bounds = array<i64: 64, 256>}, {pipeline_mode = #tpu.pipeline_mode<synchronous>, transform_indices = @transform_4, window_bounds = array<i64: 1, 256>}, {pipeline_mode = #tpu.pipeline_mode<synchronous>, transform_indices = @transform_5, window_bounds = array<i64: 256, 64>}, {pipeline_mode = #tpu.pipeline_mode<synchronous>, transform_indices = @transform_6, window_bounds = array<i64: 1, 64>}, {transform_indices = @transform_7, window_bounds = array<i64: 8, 64>}]} {
    %c0 = arith.constant 0 : index
    %c0_0 = arith.constant 0 : index
    %0 = vector.load %arg1[%c0, %c0_0] : memref<8x4xf32, #tpu.memory_space<vmem>>, vector<8x4xf32>
    %c0_1 = arith.constant 0 : index
    %c0_2 = arith.constant 0 : index
    %1 = vector.load %arg2[%c0_1, %c0_2] : memref<4x64xf32, #tpu.memory_space<vmem>>, vector<4x64xf32>
    %c0_3 = arith.constant 0 : index
    %c0_4 = arith.constant 0 : index
    %2 = vector.load %arg3[%c0_3, %c0_4] : memref<1x64xf32, #tpu.memory_space<vmem>>, vector<1x64xf32>
    %cst = arith.constant dense<0.000000e+00> : vector<8x64xf32>
    %3 = tpu.matmul %0, %1, %cst {dimension_numbers = #tpu.dot_dimension_numbers<[1], [0], [0], [1], [0, 0, 1, 1], [], []>} : vector<8x4xf32>, vector<4x64xf32>, vector<8x64xf32> -> vector<8x64xf32>
    %4 = vector.broadcast %2 : vector<1x64xf32> to vector<8x64xf32>
    %5 = arith.addf %3, %4 : vector<8x64xf32>
    %cst_5 = arith.constant 0.000000e+00 : f32
    %6 = vector.broadcast %cst_5 : f32 to vector<8x64xf32>
    %7 = arith.maximumf %5, %6 : vector<8x64xf32>
    %c0_6 = arith.constant 0 : index
    %c0_7 = arith.constant 0 : index
    %8 = vector.load %arg4[%c0_6, %c0_7] : memref<64x256xf32, #tpu.memory_space<vmem>>, vector<64x256xf32>
    %c0_8 = arith.constant 0 : index
    %c0_9 = arith.constant 0 : index
    %9 = vector.load %arg5[%c0_8, %c0_9] : memref<1x256xf32, #tpu.memory_space<vmem>>, vector<1x256xf32>
    %cst_10 = arith.constant dense<0.000000e+00> : vector<8x256xf32>
    %10 = tpu.matmul %7, %8, %cst_10 {dimension_numbers = #tpu.dot_dimension_numbers<[1], [0], [0], [1], [0, 0, 1, 1], [], []>} : vector<8x64xf32>, vector<64x256xf32>, vector<8x256xf32> -> vector<8x256xf32>
    %11 = vector.broadcast %9 : vector<1x256xf32> to vector<8x256xf32>
    %12 = arith.addf %10, %11 : vector<8x256xf32>
    %cst_11 = arith.constant 0.000000e+00 : f32
    %13 = vector.broadcast %cst_11 : f32 to vector<8x256xf32>
    %14 = arith.maximumf %12, %13 : vector<8x256xf32>
    %c0_12 = arith.constant 0 : index
    %c0_13 = arith.constant 0 : index
    %15 = vector.load %arg6[%c0_12, %c0_13] : memref<256x64xf32, #tpu.memory_space<vmem>>, vector<256x64xf32>
    %c0_14 = arith.constant 0 : index
    %c0_15 = arith.constant 0 : index
    %16 = vector.load %arg7[%c0_14, %c0_15] : memref<1x64xf32, #tpu.memory_space<vmem>>, vector<1x64xf32>
    %cst_16 = arith.constant dense<0.000000e+00> : vector<8x64xf32>
    %17 = tpu.matmul %14, %15, %cst_16 {dimension_numbers = #tpu.dot_dimension_numbers<[1], [0], [0], [1], [0, 0, 1, 1], [], []>} : vector<8x256xf32>, vector<256x64xf32>, vector<8x64xf32> -> vector<8x64xf32>
    %18 = vector.broadcast %16 : vector<1x64xf32> to vector<8x64xf32>
    %19 = arith.addf %17, %18 : vector<8x64xf32>
    %c0_17 = arith.constant 0 : index
    %c0_18 = arith.constant 0 : index
    %20 = vector.load %arg8[%c0_17, %c0_18] : memref<8x64xf32, #tpu.memory_space<vmem>>, vector<8x64xf32>
    tpu.vector_store %arg8[%c0_17, %c0_18], %19 {strides = array<i32>} : memref<8x64xf32, #tpu.memory_space<vmem>>, vector<8x64xf32>,
    return
  }
  func.func @transform_0(%arg0: i32) -> (i32, i32) {
    %c0_i32 = arith.constant 0 : i32
    %c0_i32_0 = arith.constant 0 : i32
    return %arg0, %c0_i32 : i32, i32
  }
  func.func @transform_1(%arg0: i32) -> (i32, i32) {
    %c0_i32 = arith.constant 0 : i32
    %c0_i32_0 = arith.constant 0 : i32
    %c0_i32_1 = arith.constant 0 : i32
    return %c0_i32, %c0_i32_0 : i32, i32
  }
  func.func @transform_2(%arg0: i32) -> (i32, i32) {
    %c0_i32 = arith.constant 0 : i32
    %c0_i32_0 = arith.constant 0 : i32
    %c0_i32_1 = arith.constant 0 : i32
    return %c0_i32, %c0_i32_0 : i32, i32
  }
  func.func @transform_3(%arg0: i32) -> (i32, i32) {
    %c0_i32 = arith.constant 0 : i32
    %c0_i32_0 = arith.constant 0 : i32
    %c0_i32_1 = arith.constant 0 : i32
    return %c0_i32, %c0_i32_0 : i32, i32
  }
  func.func @transform_4(%arg0: i32) -> (i32, i32) {
    %c0_i32 = arith.constant 0 : i32
    %c0_i32_0 = arith.constant 0 : i32
    %c0_i32_1 = arith.constant 0 : i32
    return %c0_i32, %c0_i32_0 : i32, i32
  }
  func.func @transform_5(%arg0: i32) -> (i32, i32) {
    %c0_i32 = arith.constant 0 : i32
    %c0_i32_0 = arith.constant 0 : i32
    %c0_i32_1 = arith.constant 0 : i32
    return %c0_i32, %c0_i32_0 : i32, i32
  }
  func.func @transform_6(%arg0: i32) -> (i32, i32) {
    %c0_i32 = arith.constant 0 : i32
    %c0_i32_0 = arith.constant 0 : i32
    %c0_i32_1 = arith.constant 0 : i32
    return %c0_i32, %c0_i32_0 : i32, i32
  }
  func.func @transform_7(%arg0: i32) -> (i32, i32) {
    %c0_i32 = arith.constant 0 : i32
    %c0_i32_0 = arith.constant 0 : i32
    return %arg0, %c0_i32 : i32, i32
  }
}

</mosaic_0001>

<bundles_post_ra>
// kernel: tile.20
= control target key start
LH: loop header
LB: loop body
LE: loop exit
PB: predicated region body
PF: predicated region fallthrough
CT: control target
= control target key end

     0   :  { %s22_s0 = inlined_call_operand.vmem [shape: f32[16], index: 0, kind: input, shape index: {}]   ;;  %s23_s1 = inlined_call_operand.vmem [shape: f32[4,16], index: 1, kind: output, shape index: {}]  }
   0x1   :  { %v4_v0 = vld [vmem:[%s22_s0] ss:$0 sm:$0xff] }
   0x2   :  { %5 = vst [vmem:[%s23_s1] sm:$0xf] %v4_v0 }

// kernel: tile.21
= control target key start
LH: loop header
LB: loop body
LE: loop exit
PB: predicated region body
PF: predicated region fallthrough
CT: control target
= control target key end

     0   :  { %vm8_vm0 = vcmask 130048   ;;  %s40_s8 = smov 16   ;;  %s41_s9 = smov 32   ;;  %vm14_vm1 = vcmask 523648   ;;  %vm20_vm2 = vcmask 392448   ;;  %vm26_vm3 = vcmask 261248   ;;  %s58_s0 = inlined_call_operand.vmem [shape: f32[4,16], index: 0, kind: input, shape index: {}]   ;;  %s59_s1 = inlined_call_operand.vmem [shape: f32[1,64], index: 1, kind: output, shape index: {}]  }
   0x1   :  { %v5_v0 = vld [vmem:[%s58_s0] sm:$0xf]  ;;  %s39_s0 = smov 48  }
   0x2   :  { %6 = vst [vmem:[#allocation1] sm:$0xf] %v5_v0 }
   0x9   :  { %v11_v1 = vld [vmem:[#allocation1 + $0x3] sm:$0x1]   ;;  %v23_v2 = vld [vmem:[#allocation1 + $0x1] sm:$0x1]   ;;  %v7_v3 = vld [vmem:[#allocation1] sm:$0x1]  }
   0xa   :  { %12 = vrot.lane.b32.xlu0 %v11_v1, %s39_s0  ;;  %24 = vrot.lane.b32.xlu1 %v23_v2, %s40_s8  ;;  %v17_v4 = vld [vmem:[#allocation1 + $0x2] sm:$0x1]   ;;  %9 = vst.msk [vmem:[#allocation0] sm:$0x1] %vm8_vm0, %v7_v3  }
   0xe   :  { %18 = vrot.lane.b32.xlu0 %v17_v4, %s41_s9 }
  0x7c   :  { %v13_v5 = vpop.permute.xlu0 %12   ;;  %v25_v6 = vpop.permute.xlu1 %24  }
  0x7d   :  { %15 = vst.msk [vmem:[#allocation0] sm:$0x1] %vm14_vm1, %v13_v5  }
  0x80   :  { %v19_v7 = vpop.permute.xlu0 %18  }
  0x81   :  { %21 = vst.msk [vmem:[#allocation0] sm:$0x1] %vm20_vm2, %v19_v7  }
  0x82   :  { %27 = vst.msk [vmem:[#allocation0] sm:$0x1] %vm26_vm3, %v25_v6  }
  0x89   :  { %v32_v8 = vld [vmem:[#allocation0] sm:$0x1] }
  0x8a   :  { %35 = vst [vmem:[%s59_s1] sm:$0x1] %v32_v8 }

// kernel: tile.15
= control target key start
LH: loop header
LB: loop body
LE: loop exit
PB: predicated region body
PF: predicated region fallthrough
CT: control target
= control target key end

     0   :  { %s22_s0 = inlined_call_operand.vmem [shape: f32[128], index: 0, kind: input, shape index: {}]   ;;  %s23_s1 = inlined_call_operand.vmem [shape: f32[2,128], index: 1, kind: output, shape index: {}]  }
   0x1   :  { %v4_v0 = vld [vmem:[%s22_s0] ss:$0 sm:$0xff] }
   0x2   :  { %5 = vst [vmem:[%s23_s1] sm:$0x3] %v4_v0 }

// kernel: convnet_forward.1
= control target key start
LH: loop header
LB: loop body
LE: loop exit
PB: predicated region body
PF: predicated region fallthrough
CT: control target
= control target key end

     0   :  { %s746_s24 = smov 0   ;;  %s928_s0 = inlined_call_operand.vmem [shape: f32[16,4], index: 0, kind: input, shape index: {}]   ;;  %s929_s1 = inlined_call_operand.vmem [shape: f32[4,64], index: 1, kind: input, shape index: {}]   ;;  %s930_s2 = inlined_call_operand.vmem [shape: f32[1,64], index: 2, kind: input, shape index: {}]   ;;  %s931_s3 = inlined_call_operand.vmem [shape: f32[64,256], index: 3, kind: input, shape index: {}]   ;;  %s932_s4 = inlined_call_operand.vmem [shape: f32[1,256], index: 4, kind: input, shape index: {}]   ;;  %s933_s5 = inlined_call_operand.vmem [shape: f32[256,64], index: 5, kind: input, shape index: {}]   ;;  %s934_s6 = inlined_call_operand.vmem [shape: f32[1,64], index: 6, kind: input, shape index: {}]   ;;  %s935_s7 = inlined_call_operand.vmem [shape: f32[16,64], index: 7, kind: output, shape index: {}]  }
   0x1 LB: > { %s630_s25 = sadd.s32 4294967295, %s702_s24   ;;  %p634_p0 = scmp.ge.s32.totalorder %s702_s24, 1  ;;  %s702_s24 = sphi %s746_s24, %s17_s24  }
   0x2   : > { %p236_p1 = scmp.lt.s32.totalorder %s702_s24, 3 }
   0x4   : > { %p237_p2 = pnand %p634_p0, %p236_p1 }
   0x5   : > { %p266_p3 = scmp.lt.s32.totalorder (!%p237_p2), %s630_s25, 1 }
   0x6   : > { %240 = sbr.rel (%p237_p2) target bundleno = 613 (0x265), region = 48 }
   0xb   : > { %v275_v0 = vld [vmem:[%s929_s1] sm:$0xf]  ;;  %vm287_vm0 = vcmask 1043456   ;;  %v704_v1 = vmov 0.0   ;;  %vm705_vm1 = vmmov 0   ;;  %v377_v2 = vld [vmem:[%s931_s3 + $0x78] sm:$0xff]  ;;  %v380_v56 = vlaneseq }
   0xc   : > { %681 = vmatprep.subr.mxu1 %v704_v1  ;;  %683 = vmatprep.mubr.msk.f32.mxu1 %vm705_vm1, %v704_v1  ;;  %s937_s25 = smov (!%p266_p3, %s630_s25), 1  ;;  %vm283_vm2 = vcmask 31744   ;;  %v376_v3 = vld [vmem:[%s931_s3 + $0x70] sm:$0xff]  ;;  %v375_v5 = vld [vmem:[%s931_s3 + $0x68] sm:$0xff]  ;;  %v374_v6 = vld [vmem:[%s931_s3 + $0x60] sm:$0xff]  ;;  %vm390_vm3 = vcmask 523264  }
   0xd   : > { %682 = vmatpush3.msk.msra.mxu1 %vm287_vm0, %v275_v0  ;;  %s635_s30 = sshll.u32 %s937_s25, 3  ;;  %v373_v7 = vld [vmem:[%s931_s3 + $0x58] sm:$0xff]  ;;  %v372_v8 = vld [vmem:[%s931_s3 + $0x50] sm:$0xff]  ;;  %v371_v9 = vld [vmem:[%s931_s3 + $0x48] sm:$0xff]  ;;  %v381_v57 = vshrl.u32 %v380_v56, 7 }
   0xe   : > { %410 = vmatprep.subr.mxu1 %v377_v2  ;;  %s269_s10 = scalar_lea.vmem %s928_s0, %s635_s30  ;;  %v370_v10 = vld [vmem:[%s931_s3 + $0x40] sm:$0xff]  ;;  %v369_v11 = vld [vmem:[%s931_s3 + $0x38] sm:$0xff]  ;;  %v368_v12 = vld [vmem:[%s931_s3 + $0x30] sm:$0xff]  ;;  %s273_s13 = scalar_lea.vmem %s935_s7, %s635_s30 }
   0xf   : > { %v274_v4 = vld [vmem:[%s269_s10] sm:$0xff]  ;;  %v367_v13 = vld [vmem:[%s931_s3 + $0x28] sm:$0xff]  ;;  %v365_v15 = vld [vmem:[%s931_s3 + $0x18] sm:$0xff]  ;;  %v382_v58 = vsub.s32 0, %v381_v57  ;;  %v386_v60 = vsub.s32 1, %v381_v57 }
  0x10   : > { %684 = vmatmul.mubr.msk.f32.vlgmr.msra.gmra.mxu1 %vm283_vm2, %v274_v4  ;;  %v366_v14 = vld [vmem:[%s931_s3 + $0x20] sm:$0xff]  ;;  %v364_v16 = vld [vmem:[%s931_s3 + $0x10] sm:$0xff]  ;;  %v363_v17 = vld [vmem:[%s931_s3 + $0x8] sm:$0xff] }
  0x11   : > { %411 = vmatpush1.msra.mxu1 %v376_v3  ;;  %458 = vmatprep.mubr.f32.mxu1 %v704_v1  ;;  %v362_v18 = vld [vmem:[%s931_s3] sm:$0xff]  ;;  %v498_v19 = vld [vmem:[%s933_s5 + $0xf8] sm:$0xff]  ;;  %v497_v21 = vld [vmem:[%s933_s5 + $0xf0] sm:$0xff] }
  0x12   : > { %412 = vmatprep.subr.mxu1 %v375_v5  ;;  %v482_v20 = vld [vmem:[%s933_s5 + $0x78] sm:$0xff]  ;;  %646 = vmatprep.subr.mxu0 %v498_v19  ;;  %v481_v22 = vld [vmem:[%s933_s5 + $0x70] sm:$0xff]  ;;  %v496_v23 = vld [vmem:[%s933_s5 + $0xe8] sm:$0xff] }
  0x13   : > { %413 = vmatpush1.msra.mxu1 %v374_v6  ;;  %647 = vmatpush3.msra.mxu0 %v482_v20  ;;  %v480_v24 = vld [vmem:[%s933_s5 + $0x68] sm:$0xff]  ;;  %v495_v25 = vld [vmem:[%s933_s5 + $0xe0] sm:$0xff]  ;;  %v494_v27 = vld [vmem:[%s933_s5 + $0xd8] sm:$0xff] }
  0x14   : > { %414 = vmatprep.subr.mxu1 %v373_v7  ;;  %648 = vmatprep.subr.mxu0 %v497_v21  ;;  %v479_v26 = vld [vmem:[%s933_s5 + $0x60] sm:$0xff]  ;;  %v478_v28 = vld [vmem:[%s933_s5 + $0x58] sm:$0xff]  ;;  %v493_v29 = vld [vmem:[%s933_s5 + $0xd0] sm:$0xff] }
  0x15   : > { %415 = vmatpush1.msra.mxu1 %v372_v8  ;;  %649 = vmatpush3.msra.mxu0 %v481_v22  ;;  %v477_v30 = vld [vmem:[%s933_s5 + $0x50] sm:$0xff]  ;;  %v492_v31 = vld [vmem:[%s933_s5 + $0xc8] sm:$0xff]  ;;  %v491_v33 = vld [vmem:[%s933_s5 + $0xc0] sm:$0xff] }
  0x16   : > { %416 = vmatprep.subr.mxu1 %v371_v9  ;;  %650 = vmatprep.subr.mxu0 %v496_v23  ;;  %v476_v32 = vld [vmem:[%s933_s5 + $0x48] sm:$0xff]  ;;  %v475_v34 = vld [vmem:[%s933_s5 + $0x40] sm:$0xff]  ;;  %v490_v35 = vld [vmem:[%s933_s5 + $0xb8] sm:$0xff] }
  0x17   : > { %417 = vmatpush1.msra.mxu1 %v370_v10  ;;  %651 = vmatpush3.msra.mxu0 %v480_v24  ;;  %v474_v36 = vld [vmem:[%s933_s5 + $0x38] sm:$0xff]  ;;  %v489_v37 = vld [vmem:[%s933_s5 + $0xb0] sm:$0xff]  ;;  %v488_v39 = vld [vmem:[%s933_s5 + $0xa8] sm:$0xff] }
  0x18   : > { %418 = vmatprep.subr.mxu1 %v369_v11  ;;  %652 = vmatprep.subr.mxu0 %v495_v25  ;;  %v473_v38 = vld [vmem:[%s933_s5 + $0x30] sm:$0xff]  ;;  %v472_v40 = vld [vmem:[%s933_s5 + $0x28] sm:$0xff]  ;;  %v487_v41 = vld [vmem:[%s933_s5 + $0xa0] sm:$0xff] }
  0x19   : > { %419 = vmatpush1.msra.mxu1 %v368_v12  ;;  %653 = vmatpush3.msra.mxu0 %v479_v26  ;;  %v471_v42 = vld [vmem:[%s933_s5 + $0x20] sm:$0xff]  ;;  %v486_v48 = vld [vmem:[%s933_s5 + $0x98] sm:$0xff]  ;;  %v485_v50 = vld [vmem:[%s933_s5 + $0x90] sm:$0xff] }
  0x1a   : > { %420 = vmatprep.subr.mxu1 %v367_v13  ;;  %654 = vmatprep.subr.mxu0 %v494_v27  ;;  %v637_v43 = vld [vmem:[%s930_s2] ss:$0 sm:$0xff]  ;;  %v470_v49 = vld [vmem:[%s933_s5 + $0x18] sm:$0xff]  ;;  %v469_v51 = vld [vmem:[%s933_s5 + $0x10] sm:$0xff] }
  0x1b   : > { %421 = vmatpush1.msra.mxu1 %v366_v14  ;;  %655 = vmatpush3.msra.mxu0 %v478_v28  ;;  %v484_v52 = vld [vmem:[%s933_s5 + $0x88] sm:$0xff]  ;;  %v483_v54 = vld [vmem:[%s933_s5 + $0x80] sm:$0xff] }
  0x1c   : > { %422 = vmatprep.subr.mxu1 %v365_v15  ;;  %656 = vmatprep.subr.mxu0 %v493_v29  ;;  %v468_v53 = vld [vmem:[%s933_s5 + $0x8] sm:$0xff]  ;;  %v467_v55 = vld [vmem:[%s933_s5] sm:$0xff] }
  0x1d   : > { %423 = vmatpush1.msra.mxu1 %v364_v16  ;;  %657 = vmatpush3.msra.mxu0 %v477_v30  ;;  %v378_v59 = vld [vmem:[%s932_s4] sm:$0x3] }
  0x1e   : > { %424 = vmatprep.subr.mxu1 %v363_v17  ;;  %658 = vmatprep.subr.mxu0 %v492_v31  ;;  %v383_v61 = vrot.slane %v378_v59, %v382_v58  ;;  %v387_v62 = vrot.slane %v378_v59, %v386_v60  ;;  %v641_v6 = vld [vmem:[%s934_s6] ss:$0 sm:$0xff] }
  0x1f   : > { %425 = vmatpush1.msra.mxu1 %v362_v18  ;;  %659 = vmatpush3.msra.mxu0 %v476_v32 }
  0x20   : > { %660 = vmatprep.subr.mxu0 %v491_v33 }
  0x21   : > { %661 = vmatpush3.msra.mxu0 %v475_v34 }
  0x22   : > { %662 = vmatprep.subr.mxu0 %v490_v35 }
  0x23   : > { %663 = vmatpush3.msra.mxu0 %v474_v36 }
  0x24   : > { %664 = vmatprep.subr.mxu0 %v489_v37 }
  0x25   : > { %665 = vmatpush3.msra.mxu0 %v473_v38 }
  0x26   : > { %666 = vmatprep.subr.mxu0 %v488_v39 }
  0x27   : > { %667 = vmatpush3.msra.mxu0 %v472_v40 }
  0x28   : > { %668 = vmatprep.subr.mxu0 %v487_v41 }
  0x29   : > { %669 = vmatpush3.msra.mxu0 %v471_v42 }
  0x2a   : > { %670 = vmatprep.subr.mxu0 %v486_v48 }
  0x2b   : > { %671 = vmatpush3.msra.mxu0 %v470_v49 }
  0x2c   : > { %672 = vmatprep.subr.mxu0 %v485_v50 }
  0x2d   : > { %673 = vmatpush3.msra.mxu0 %v469_v51 }
  0x2e   : > { %674 = vmatprep.subr.mxu0 %v484_v52 }
  0x2f   : > { %675 = vmatpush3.msra.mxu0 %v468_v53 }
  0x30   : > { %676 = vmatprep.subr.mxu0 %v483_v54 }
  0x31   : > { %677 = vmatpush3.msra.mxu0 %v467_v55 }
  0xd0   : > { %v357_v44 = vpop.f32.mrf.mxu1 }
  0xd1   : > { %v358_v45 = vadd.f32 %v637_v43, %v357_v44 }
  0xd2   : > { %v685_v46 = vpop.f32.mrf.mxu1 }
  0xd3   : > { %v361_v47 = vmax.f32 %v358_v45, 0.0 }
  0xd5   : > { %640 = vmatmul.mubr.msk.f32.vlgmr.msra.gmra.mxu1 %vm390_vm3, %v361_v47 }
 0x195   : > { %v460_v63 = vpop.f32.mrf.mxu1 }
 0x196   : > { %v461_v0 = vadd.f32 %v460_v63, %v383_v61 }
 0x197   : > { %v462_v1 = vpop.f32.mrf.mxu1 }
 0x198   : > { %v463_v2 = vadd.f32 %v462_v1, %v387_v62  ;;  %v465_v4 = vmax.f32 %v461_v0, 0.0 }
 0x19a   : > { %v466_v3 = vmax.f32 %v463_v2, 0.0 }
 0x19c   : > { %570 = vmatprep.mubr.f32.mxu0 %v466_v3 }
 0x19d   : > { %571 = vmatmul.mubr.f32.vlgmr.msra.gmra.mxu0 %v465_v4 }
 0x25d   : > { %v678_v5 = vpop.f32.mrf.mxu0 }
 0x25f   : > { %v679_v7 = vpop.f32.mrf.mxu0 }
 0x260   : > { %v680_v8 = vadd.f32 %v679_v7, %v678_v5 }
 0x262   : > { %v573_v9 = vadd.f32 %v680_v8, %v641_v6 }
 0x264   : > { %576 = vst.msk [vmem:[%s273_s13] sm:$0xff] %vm390_vm3, %v573_v9 }
 0x265 PF: > { %s17_s24 = sadd.s32 1, %s702_s24  }
 0x266   : > { %p14_p4 = scmp.ge.s32.totalorder %s17_s24, 4  }
 0x268   :  { %16 = sbr.rel (!%p14_p4) target bundleno = 1 (0x1), region = 78 }

</bundles_post_ra>
